<compile_context>
chip_gen: v7x
topology: tpu7x:2x2x1
jax: 0.10.0
libtpu: 0.0.40
codegen_flags: <defaults>
</compile_context>

<pallas_src>
import numpy as np
import jax
import jax.numpy as jnp
from jax.experimental import pallas as pl
from jax.experimental.pallas import tpu as pltpu


def _area_matrix(in_size: int, out_size: int) -> np.ndarray:
    """Averaging matrix R (out_size, in_size) matching adaptive_avg_pool1d bins."""
    R = np.zeros((out_size, in_size), dtype=np.float32)
    for i in range(out_size):
        start = (i * in_size) // out_size
        end = -((-(i + 1) * in_size) // out_size)  # ceil((i+1)*in/out)
        R[i, start:end] = 1.0 / (end - start)
    return R


def _resize_kernel(rh_ref, rwt_ref, x_ref, o_ref):
    # rh_ref : (H_out, H_in)   row-averaging matrix
    # rwt_ref: (W_in,  W_out)  column-averaging matrix, pre-transposed on host
    # x_ref  : (B, H_in, W_in) B channels of the input
    # o_ref  : (B, H_out, W_out)
    b, h_in, w_in = x_ref.shape
    h_out = rh_ref.shape[0]
    w_out = rwt_ref.shape[1]
    cdt = rh_ref.dtype

    x = x_ref[...]

    # ---- W contraction ---------------------------------------------------
    if h_in % 8 == 0:
        # Fast path: fold channels into the matmul M dim -> one large MXU matmul.
        # Reshapes are layout no-ops because H_in is sublane (8) aligned.
        t = jnp.dot(x.reshape(b * h_in, w_in), rwt_ref[...],
                    preferred_element_type=jnp.float32)          # (B*H_in, W_out)
        t = t.reshape(b, h_in, w_out)
    else:
        # Safe path: batched matmul, avoids relayout of sublane-unaligned dims.
        rwt_b = jnp.broadcast_to(rwt_ref[...], (b, w_in, w_out))
        t = jnp.einsum('bhw,bwo->bho', x, rwt_b,
                       preferred_element_type=jnp.float32)       # (B, H_in, W_out)

    # ---- H contraction (on the shrunk intermediate) ------------------------
    rh_b = jnp.broadcast_to(rh_ref[...], (b, h_out, h_in))
    out = jnp.einsum('boh,bhw->bow', rh_b, t.astype(cdt),
                     preferred_element_type=jnp.float32)         # (B, H_out, W_out)

    o_ref[...] = out.astype(o_ref.dtype)


# VMEM sizing: stay within v7x's 64 MiB physical VMEM with headroom, while being
# well above the default scoped limits on v5e (16 MiB) / v6e (32 MiB).
_VMEM_LIMIT_BYTES = 48 * 1024 * 1024
_VMEM_BUDGET_BYTES = 36 * 1024 * 1024


def _roundup(v: int, m: int) -> int:
    return ((v + m - 1) // m) * m


def _choose_channel_batch(nc, h_in, w_in, h_out, w_out, x_itemsize, cdt_itemsize):
    """Largest channel batch B whose double-buffered blocks fit the VMEM budget."""
    h_in_s, h_out_s = _roundup(h_in, 8), _roundup(h_out, 8)
    w_in_l, w_out_l = _roundup(w_in, 128), _roundup(w_out, 128)
    h_in_l = _roundup(h_in, 128)
    per_ch = (2 * h_in_s * w_in_l * x_itemsize        # x block (double-buffered)
              + 2 * h_out_s * w_out_l * x_itemsize    # out block (double-buffered)
              + 2 * h_in_s * w_out_l * 4              # f32 intermediate (+ cast copy)
              + h_out_s * h_in_l * cdt_itemsize)      # per-channel broadcast of Rh
    fixed = 2 * (h_out_s * h_in_l + _roundup(w_in, 8) * w_out_l) * cdt_itemsize
    avail = max(_VMEM_BUDGET_BYTES - fixed, per_ch)
    b = max(1, min(nc, avail // per_ch))
    if nc > 1:
        # keep >= 2 grid steps so the "parallel" axis can shard across v7x's 2 TCs
        b = min(b, -(-nc // 2))
    return int(b)


def resizer_forward(x: jax.Array, size) -> jax.Array:
    """Equivalent of Resizer(size).forward(x) for NCHW float inputs.

    size follows the module convention: (w, h) or int (square).
    """
    if size is None:
        return x
    if isinstance(size, (int, float)):
        size = (int(size), int(size))
    assert len(size) == 2, "size must be (w, h)"
    w_out, h_out = int(size[0]), int(size[1])

    n, c, h_in, w_in = x.shape
    nc = n * c

    # bf16 matrices when the input is bf16 (native MXU path), f32 otherwise;
    # accumulation is f32 in both cases.
    cdt = jnp.bfloat16 if x.dtype == jnp.bfloat16 else jnp.float32
    rh = jnp.asarray(_area_matrix(h_in, h_out), dtype=cdt)          # (H_out, H_in)
    rwt = jnp.asarray(_area_matrix(w_in, w_out).T, dtype=cdt)       # (W_in, W_out), pre-transposed

    xf = x.reshape(nc, h_in, w_in)

    b = _choose_channel_batch(nc, h_in, w_in, h_out, w_out,
                              jnp.dtype(x.dtype).itemsize, jnp.dtype(cdt).itemsize)
    grid = (pl.cdiv(nc, b),)

    out = pl.pallas_call(
        _resize_kernel,
        out_shape=jax.ShapeDtypeStruct((nc, h_out, w_out), x.dtype),
        grid_spec=pltpu.PrefetchScalarGridSpec(
            num_scalar_prefetch=0,
            grid=grid,
            in_specs=[
                pl.BlockSpec((h_out, h_in), lambda i: (0, 0)),      # Rh (constant)
                pl.BlockSpec((w_in, w_out), lambda i: (0, 0)),      # Rw^T (constant)
                pl.BlockSpec((b, h_in, w_in), lambda i: (i, 0, 0)),  # B channels / step
            ],
            out_specs=pl.BlockSpec((b, h_out, w_out), lambda i: (i, 0, 0)),
        ),
        compiler_params=pltpu.CompilerParams(
            dimension_semantics=("parallel",),
            vmem_limit_bytes=_VMEM_LIMIT_BYTES,
        ),
    )(rh, rwt, xf)

    return out.reshape(n, c, h_out, w_out)


def _reference_area_resize(x, size):
    """Plain-JAX reference (adaptive avg pool via the same separable matrices)."""
    w_out, h_out = int(size[0]), int(size[1])
    n, c, h_in, w_in = x.shape
    rh = jnp.asarray(_area_matrix(h_in, h_out))
    rw = jnp.asarray(_area_matrix(w_in, w_out))
    return jnp.einsum('oh,nchw,pw->ncop', rh, x.astype(jnp.float32), rw).astype(x.dtype)


if __name__ == "__main__":
    key = jax.random.PRNGKey(0)
    # small NCHW input, resize 16x16 -> 8x8 (module size convention: (w, h))
    x = jax.random.uniform(key, (2, 4, 16, 16), dtype=jnp.float32)

    size = (8, 8)
    y = resizer_forward(x, size)
    y = jax.block_until_ready(y)
    y_ref = _reference_area_resize(x, size)
    assert y.shape == (2, 4, 8, 8), y.shape
    assert jnp.allclose(y, y_ref, atol=1e-5, rtol=1e-5), "mismatch vs reference (8,8)"

    # non-square resize checks the (w, h) size convention: w=8, h=4 -> output HxW = 4x8
    size2 = (8, 4)
    y2 = jax.block_until_ready(resizer_forward(x, size2))
    y2_ref = _reference_area_resize(x, size2)
    assert y2.shape == (2, 4, 4, 8), y2.shape
    assert jnp.allclose(y2, y2_ref, atol=1e-5, rtol=1e-5), "mismatch vs reference (8,4)"

    print("KERNEL_OK")
</pallas_src>

<mosaic_0001>
module attributes {stable_mosaic.version = 11 : i64} {
  func.func @_resize_kernel(%arg0: i32, %arg1: memref<8x16xf32, #tpu.memory_space<vmem>>, %arg2: memref<16x8xf32, #tpu.memory_space<vmem>>, %arg3: memref<4x16x16xf32, #tpu.memory_space<vmem>>, %arg4: memref<4x8x8xf32, #tpu.memory_space<vmem>>) attributes {dimension_semantics = [#tpu.dimension_semantics<parallel>], iteration_bounds = array<i64: 2>, scalar_prefetch = 0 : i64, scratch_operands = 0 : i64, tpu.core_type = #tpu.core_type<tc>, window_params = [{pipeline_mode = #tpu.pipeline_mode<synchronous>, transform_indices = @transform_0, window_bounds = array<i64: 8, 16>}, {pipeline_mode = #tpu.pipeline_mode<synchronous>, transform_indices = @transform_1, window_bounds = array<i64: 16, 8>}, {transform_indices = @transform_2, window_bounds = array<i64: 4, 16, 16>}, {transform_indices = @transform_3, window_bounds = array<i64: 4, 8, 8>}]} {
    %c0 = arith.constant 0 : index
    %c0_0 = arith.constant 0 : index
    %c0_1 = arith.constant 0 : index
    %0 = vector.load %arg3[%c0, %c0_0, %c0_1] : memref<4x16x16xf32, #tpu.memory_space<vmem>>, vector<4x16x16xf32>
    %1 = vector.shape_cast %0 : vector<4x16x16xf32> to vector<64x16xf32>
    %c0_2 = arith.constant 0 : index
    %c0_3 = arith.constant 0 : index
    %2 = vector.load %arg2[%c0_2, %c0_3] : memref<16x8xf32, #tpu.memory_space<vmem>>, vector<16x8xf32>
    %cst = arith.constant dense<0.000000e+00> : vector<64x8xf32>
    %3 = tpu.matmul %1, %2, %cst {dimension_numbers = #tpu.dot_dimension_numbers<[1], [0], [0], [1], [0, 0, 1, 1], [], []>} : vector<64x16xf32>, vector<16x8xf32>, vector<64x8xf32> -> vector<64x8xf32>
    %4 = vector.shape_cast %3 : vector<64x8xf32> to vector<4x16x8xf32>
    %c0_4 = arith.constant 0 : index
    %c0_5 = arith.constant 0 : index
    %5 = vector.load %arg1[%c0_4, %c0_5] : memref<8x16xf32, #tpu.memory_space<vmem>>, vector<8x16xf32>
    %6 = vector.shape_cast %5 : vector<8x16xf32> to vector<1x8x16xf32>
    %7 = vector.broadcast %6 : vector<1x8x16xf32> to vector<4x8x16xf32>
    "tpu.trace_start"() <{level = 10 : i32, message = "boh,bhw->bow"}> : () -> ()
    %cst_6 = arith.constant dense<0.000000e+00> : vector<4x8x8xf32>
    %8 = tpu.matmul %7, %4, %cst_6 {dimension_numbers = #tpu.dot_dimension_numbers<[2], [1], [1], [2], [0, 0, 0, 1, 1, 2], [0], [0]>} : vector<4x8x16xf32>, vector<4x16x8xf32>, vector<4x8x8xf32> -> vector<4x8x8xf32>
    "tpu.trace_stop"() : () -> ()
    %c0_7 = arith.constant 0 : index
    %c0_8 = arith.constant 0 : index
    %c0_9 = arith.constant 0 : index
    %9 = vector.load %arg4[%c0_7, %c0_8, %c0_9] : memref<4x8x8xf32, #tpu.memory_space<vmem>>, vector<4x8x8xf32>
    tpu.vector_store %arg4[%c0_7, %c0_8, %c0_9], %8 {strides = array<i32>} : memref<4x8x8xf32, #tpu.memory_space<vmem>>, vector<4x8x8xf32>,
    return
  }
  func.func @transform_0(%arg0: i32) -> (i32, i32) {
    %c0_i32 = arith.constant 0 : i32
    %c0_i32_0 = arith.constant 0 : i32
    %c0_i32_1 = arith.constant 0 : i32
    return %c0_i32, %c0_i32_0 : i32, i32
  }
  func.func @transform_1(%arg0: i32) -> (i32, i32) {
    %c0_i32 = arith.constant 0 : i32
    %c0_i32_0 = arith.constant 0 : i32
    %c0_i32_1 = arith.constant 0 : i32
    return %c0_i32, %c0_i32_0 : i32, i32
  }
  func.func @transform_2(%arg0: i32) -> (i32, i32, i32) {
    %c0_i32 = arith.constant 0 : i32
    %c0_i32_0 = arith.constant 0 : i32
    %c0_i32_1 = arith.constant 0 : i32
    return %arg0, %c0_i32, %c0_i32_0 : i32, i32, i32
  }
  func.func @transform_3(%arg0: i32) -> (i32, i32, i32) {
    %c0_i32 = arith.constant 0 : i32
    %c0_i32_0 = arith.constant 0 : i32
    %c0_i32_1 = arith.constant 0 : i32
    return %arg0, %c0_i32, %c0_i32_0 : i32, i32, i32
  }
}

</mosaic_0001>

<bundles_post_ra>
// kernel: tpu_custom_call.1
= control target key start
LH: loop header
LB: loop body
LE: loop exit
PB: predicated region body
PF: predicated region fallthrough
CT: control target
= control target key end

     0   :  { %8 = vsyncpa [#allocation3], 0  ;;  %s1192_s0 = inlined_call_operand.vmem [shape: f32[8,16], index: 0, kind: input, shape index: {}]   ;;  %s1193_s1 = inlined_call_operand.vmem [shape: f32[16,8], index: 1, kind: input, shape index: {}]   ;;  %s1194_s2 = inlined_call_operand.hbm [shape: f32[8,16,16], index: 2, kind: input, shape index: {}]   ;;  %s1195_s3 = inlined_call_operand.hbm [shape: f32[8,8,8], index: 3, kind: output, shape index: {}]  }
   0x1   :  { %10 = vsyncpa [#allocation3 + $0x1], 0 }
   0x2   :  { %11 = vsyncpa [#allocation4], 0 }
   0x3   :  { %13 = vsyncpa [#allocation4 + $0x1], 0  ;;  %s1000_s12 = smov 0   ;;  %s1002_s13 = smov 0  }
   0x4   :  { %s1004_s14 = smov 0   ;;  %s1006_s15 = smov 0  }
   0x5 LB: > { %s1021_s16 = sadd.s32 4294967295, %s969_s15   ;;  %s708_s17 = sadd.s32 4294967294, %s969_s15   ;;  %s969_s15 = sphi %s1006_s15, %s1208_s15   ;;  %s965_s14 = sphi %s1004_s14, %s1207_s14   ;;  %s961_s13 = sphi %s1002_s13, %s1206_s13   ;;  %s957_s12 = sphi %s1000_s12, %s1205_s12  }
   0x6   : > { %s1025_s18 = sadd.s32 1, %s969_s15   ;;  %s68_s19 = sadd.s32 1, %s965_s14 }
   0x7   : > { %s65_s20 = ssub.s32 %s969_s15, %s1025_s18  ;;  %p75_p0 = scmp.ne.s32.totalorder %s965_s14, %s961_s13 }
   0x8   : > { %p66_p1 = scmp.eq.s32.totalorder %s65_s20, 0  ;;  %p76_p2 = scmp.eq.s32.totalorder %s969_s15, 0 }
   0x9   : > { %p81_p3 = scmp.ne.s32.totalorder %s961_s13, %s957_s12  ;;  %p82_p4 = scmp.eq.s32.totalorder %s1021_s16, 0 }
   0xa   : > { %s1037_s21 = scalar_select %p66_p1, %s965_s14, %s68_s19  }
   0xb   : > { %p1039_p5 = por %p76_p2, %p75_p0  ;;  %p1043_p6 = por %p82_p4, %p81_p3 }
   0xc   : > { %p105_p7 = scmp.eq.s32.totalorder %s1021_s16, 1  ;;  %p111_p8 = scmp.eq.s32.totalorder %s708_s17, 1 }
   0xd   : > { %p832_p10 = scmp.lt.s32.totalorder %s969_s15, 2  ;;  %s137_s26 = sand.u32 1, %s965_s14  }
   0xe   : > { %p1050_p11 = por %p105_p7, %p75_p0  ;;  %p1054_p12 = por %p111_p8, %p81_p3 }
   0xf   : > { %s736_s27 = sshll.u32 %s969_s15, 10  ;;  %s711_s28 = sshll.u32 %s137_s26, 6 }
  0x10   : > { %s1199_s24 = scalar_select %p1050_p11, 1, 0 }
  0x11   : > { %s1200_s25 = scalar_select %p1054_p12, 1, 0 }
  0x12   : > { %s1063_s4 = scalar_lea.hbm %s1194_s2, %s736_s27  ;;  %s141_s5 = scalar_lea.vmem [#allocation2], %s711_s28 }
  0x13   : > { %s149_s6 = sshll.u32 %s141_s5, 4  ;;  %p1067_p13 = pnand %p832_p10, %p1039_p5  ;;  %s1071_s6 = int_to_ptr.vmem [resolvable:$true] %s149_s6 }
  0x14   : > { %s1073_s8 = scalar_lea.sflag [#allocation3], %s137_s26  ;;  %s873_s9 = scalar_lea.hbm %s1063_s4, 1024 }
  0x15   : > { %p874_p0 = scmp.ne.s32.totalorder %s1063_s4, %s873_s9  ;;  %p875_p1 = pneg %p1067_p13 }
  0x16   : > { %s878_s17 = scalar_lea.hbm %s1194_s2, 2048  ;;  %p879_p4 = scmp.lt.u32.totalorder %s1063_s4, %s1194_s2 }
  0x17   : > { %p876_p2 = pnand %p875_p1, %p874_p0  ;;  %p880_p5 = scmp.lt.u32.totalorder %s878_s17, %s873_s9 }
  0x18   : > { %p882_p8 = scmp.lt.u32.totalorder %s873_s9, %s1063_s4 }
  0x19   : > { %p877_p3 = pneg %p876_p2  ;;  %p881_p7 = por %p880_p5, %p879_p4 }
  0x1b   : > { %p883_p10 = por %p882_p8, %p881_p7 }
  0x1d   : > { %p884_p9 = pnand %p883_p10, %p877_p3 }
  0x1f   : > { %887 = shalt.err (!%p884_p9)
}
  0x20   : > { %s888_s22 = scalar_lea.vmem %s1071_s6, 1024  ;;  %s971_s26 = smov [#allocation2]  }
  0x21   : > { %p889_p0 = scmp.ne.s32.totalorder %s1071_s6, %s888_s22  ;;  %s893_s27 = sshll.u32 %s971_s26, 4  ;;  %s894_s27 = int_to_ptr.vmem [resolvable:$false] %s893_s27 }
  0x22   : > { %s895_s28 = scalar_lea.vmem %s894_s27, 2048  ;;  %p896_p11 = scmp.lt.s32.totalorder %s1071_s6, %s894_s27 }
  0x23   : > { %p891_p2 = pnand %p889_p0, %p875_p1  ;;  %p897_p4 = scmp.lt.s32.totalorder %s895_s28, %s888_s22 }
  0x25   : > { %p892_p12 = pneg %p891_p2  ;;  %p898_p5 = por %p897_p4, %p896_p11 }
  0x27   : > { %p899_p7 = pnand %p898_p5, %p892_p12 }
  0x29   : > { %902 = shalt.err (!%p899_p7)
}
  0x2a   : > { %s972_s29 = smov 128   ;;  %s973_s30 = smov 8  }
  0x2b   : > { %827 = dma.hbm_to_vmem [thread:$0]  (!%p1067_p13), %s1063_s4, 1024, %s1071_s6, %s1073_s8, %s972_s29, %s972_s29, %s973_s30  }
  0x2c   : > { %p715_p9 = scmp.ge.s32.totalorder %s969_s15, 1  ;;  %p157_p1 = scmp.lt.s32.totalorder %s969_s15, 3 }
  0x2e   : > { %p158_p3 = pnand %p715_p9, %p157_p1 }
  0x2f   : > { %s1104_s5 = sand.u32 (!%p158_p3), 1, %s961_s13  }
  0x30   : > { %161 = sbr.rel (%p158_p3) target bundleno = 520 (0x208), region = 32  ;;  %s716_s9 = sshll.u32 (!%p158_p3), %s1104_s5, 6 }
  0x31   : > { %s164_s10 = scalar_lea.sflag (!%p158_p3), [#allocation3], %s1104_s5  ;;  %s167_s11 = scalar_lea.vmem (!%p158_p3), [#allocation2], %s716_s9 }
  0x37   : > { %948 = dma.done.wait (%p1043_p6), %s164_s10, 1024  }
  0x38   : > { %950 = vsyncadd (%p1043_p6), %s164_s10, 4294966272  ;;  %vm202_vm0 = vcmask 130048   ;;  %v200_v0 = vld [vmem:[%s1193_s1] sm:$0xff]  ;;  %v201_v1 = vld [vmem:[%s1193_s1 + $0x8] sm:$0xff]  ;;  %v974_v11 = vmov 0.0|0.0   ;;  %vm975_vm1 = vmmov 0  }
  0x39   : > { %v192_v2 = vld [vmem:[%s167_s11] sm:$0xff]  ;;  %v804_v3 = vpack.c.bf16 %v201_v1, %v200_v0  ;;  %v193_v4 = vld [vmem:[%s167_s11 + $0x8] sm:$0xff]  ;;  %v194_v5 = vld [vmem:[%s167_s11 + $0x10] sm:$0xff]  ;;  %808 = vmatprep.subr.bf16.mxu1 %v974_v11  ;;  %v976_v12 = vmov 0.0   ;;  %s717_s19 = sshll.u32 %s1104_s5, 5  ;;  %vm616_vm2 = vcmask 64512  }
  0x3a   : > { %764 = vmatprep.mubr.msk.f32.mxu0 %vm202_vm0, %v192_v2  ;;  %v195_v6 = vld [vmem:[%s167_s11 + $0x18] sm:$0xff]  ;;  %v196_v7 = vld [vmem:[%s167_s11 + $0x20] sm:$0xff]  ;;  %v197_v8 = vld [vmem:[%s167_s11 + $0x28] sm:$0xff]  ;;  %780 = vmatprep.mubr.msk.f32.mxu1 %vm975_vm1, %v976_v12  ;;  %s189_s20 = scalar_lea.vmem [#allocation5], %s717_s19  ;;  %s737_s26 = sshll.u32 %s1021_s16, 9 }
  0x3b   : > { %805 = vmatprep.subr.bf16.mxu0 %v804_v3  ;;  %v198_v9 = vld [vmem:[%s167_s11 + $0x30] sm:$0xff]  ;;  %v199_v10 = vld [vmem:[%s167_s11 + $0x38] sm:$0xff]  ;;  %v332_v17 = vld [vmem:[%s1192_s0] sm:$0xff]  ;;  %s635_s22 = sshll.u32 %s189_s20, 4  ;;  %s1147_s29 = scalar_lea.hbm %s1195_s3, %s737_s26  ;;  %s1141_s22 = int_to_ptr.vmem [resolvable:$true] %s635_s22 }
  0x3c   : > { %807 = vmatpush3.bf16.msra.mxu0 %v804_v3  ;;  %s622_s30 = scalar_lea.sflag [#allocation4], %s1104_s5  ;;  %s903_s16 = scalar_lea.vmem %s1141_s22, 512 }
  0x3d   : > { %p904_p6 = scmp.ne.s32.totalorder %s1141_s22, %s903_s16  ;;  %p1202_p11 = scmp.ne.s32.totalorder %s1199_s24, 0 }
  0x3e   : > { %s977_s9 = smov [#allocation5]  }
  0x3f   : > { %765 = vmatmul.mubr.msk.f32.vlgmr.msra.gmra.mrb[0].mxu0 %vm202_vm0, %v193_v4  ;;  %p905_p12 = pnand %p904_p6, %p1202_p11  ;;  %s907_s10 = sshll.u32 %s977_s9, 4  ;;  %s908_s10 = int_to_ptr.vmem [resolvable:$false] %s907_s10 }
  0x40   : > { %767 = vmatprep.mubr.msk.f32.mxu0 %vm202_vm0, %v194_v5  ;;  %s909_s11 = scalar_lea.vmem %s908_s10, 1024  ;;  %p910_p8 = scmp.lt.s32.totalorder %s1141_s22, %s908_s10 }
  0x41   : > { %p906_p13 = pneg %p905_p12  ;;  %p911_p10 = scmp.lt.s32.totalorder %s909_s11, %s903_s16 }
  0x43   : > { %768 = vmatmul.mubr.msk.f32.gmra.mrb[2].mxu0 %vm202_vm0, %v195_v6  ;;  %p912_p0 = por %p911_p10, %p910_p8 }
  0x44   : > { %770 = vmatprep.mubr.msk.f32.mxu0 %vm202_vm0, %v196_v7 }
  0x45   : > { %p913_p2 = pnand %p912_p0, %p906_p13 }
  0x47   : > { %771 = vmatmul.mubr.msk.f32.gmra.mrb[4].mxu0 %vm202_vm0, %v197_v8 }
  0x48   : > { %773 = vmatprep.mubr.msk.f32.mxu0 %vm202_vm0, %v198_v9 }
  0x4b   : > { %774 = vmatmul.mubr.msk.f32.gmra.mrb[6].mxu0 %vm202_vm0, %v199_v10 }
 0x112   : > { %v766_v13 = vpop.f32.mrb[0].mxu0 }
 0x113   : > { %v293_v14 = vpop.f32.mrb[1].mxu0 }
 0x114   : > { %v809_v15 = vpack.c.bf16 %v766_v13, %v293_v14 }
 0x116   : > { %v769_v16 = vpop.f32.mrb[2].mxu0  ;;  %810 = vmatpush3.bf16.msra.mxu1 %v809_v15 }
 0x117   : > { %v303_v18 = vpop.f32.mrb[3].mxu0  ;;  %811 = vmatprep.subr.bf16.mxu1 %v974_v11 }
 0x118   : > { %v812_v19 = vpack.c.bf16 %v769_v16, %v303_v18 }
 0x119   : > { %781 = vmatmul.mubr.msk.f32.vlgmr.msra.gmra.mrb[0].mxu1 %vm202_vm0, %v332_v17 }
 0x11a   : > { %v772_v20 = vpop.f32.mrb[4].mxu0  ;;  %813 = vmatpush3.bf16.msra.mxu1 %v812_v19  ;;  %787 = vmatprep.mubr.msk.f32.mxu1 %vm975_vm1, %v976_v12 }
 0x11b   : > { %v313_v21 = vpop.f32.mrb[5].mxu0  ;;  %814 = vmatprep.subr.bf16.mxu1 %v974_v11 }
 0x11c   : > { %v815_v22 = vpack.c.bf16 %v772_v20, %v313_v21 }
 0x11d   : > { %788 = vmatmul.mubr.msk.f32.vlgmr.msra.gmra.mrb[2].mxu1 %vm202_vm0, %v332_v17 }
 0x11e   : > { %v775_v23 = vpop.f32.mrb[6].mxu0  ;;  %816 = vmatpush3.bf16.msra.mxu1 %v815_v22  ;;  %794 = vmatprep.mubr.msk.f32.mxu1 %vm975_vm1, %v976_v12 }
 0x11f   : > { %v323_v24 = vpop.f32.mrb[7].mxu0  ;;  %817 = vmatprep.subr.bf16.mxu1 %v974_v11 }
 0x120   : > { %v818_v25 = vpack.c.bf16 %v775_v23, %v323_v24 }
 0x121   : > { %795 = vmatmul.mubr.msk.f32.vlgmr.msra.gmra.mrb[4].mxu1 %vm202_vm0, %v332_v17 }
 0x122   : > { %819 = vmatpush3.bf16.msra.mxu1 %v818_v25  ;;  %801 = vmatprep.mubr.msk.f32.mxu1 %vm975_vm1, %v976_v12 }
 0x125   : > { %802 = vmatmul.mubr.msk.f32.vlgmr.msra.gmra.mrb[6].mxu1 %vm202_vm0, %v332_v17 }
 0x1ec   : > { %v402_v26 = vpop.f32.mrb[0].mxu1 }
 0x1ed   : > { %617 = vst.msk [vmem:[%s189_s20] sm:$0xff] %vm616_vm2, %v402_v26  ;;  %v782_v27 = vpop.f32.mrb[1].mxu1 }
 0x1f0   : > { %v472_v28 = vpop.f32.mrb[2].mxu1 }
 0x1f1   : > { %618 = vst.msk [vmem:[%s189_s20 + $0x8] sm:$0xff] %vm616_vm2, %v472_v28  ;;  %v789_v29 = vpop.f32.mrb[3].mxu1 }
 0x1f4   : > { %v542_v30 = vpop.f32.mrb[4].mxu1 }
 0x1f5   : > { %619 = vst.msk [vmem:[%s189_s20 + $0x10] sm:$0xff] %vm616_vm2, %v542_v30  ;;  %v796_v31 = vpop.f32.mrb[5].mxu1 }
 0x1f8   : > { %v612_v32 = vpop.f32.mrb[6].mxu1 }
 0x1f9   : > { %620 = vst.msk [vmem:[%s189_s20 + $0x18] sm:$0xff] %vm616_vm2, %v612_v32  ;;  %v803_v33 = vpop.f32.mrb[7].mxu1 }
 0x1fa   : > { %916 = shalt.err (!%p913_p2)
}
 0x1fb   : > { %s917_s4 = scalar_lea.hbm %s1147_s29, 512  ;;  %s921_s8 = scalar_lea.hbm %s1195_s3, 1024 }
 0x1fc   : > { %p918_p4 = scmp.ne.s32.totalorder %s1147_s29, %s917_s4  ;;  %p922_p9 = scmp.lt.u32.totalorder %s1147_s29, %s1195_s3 }
 0x1fd   : > { %p923_p1 = scmp.lt.u32.totalorder %s921_s8, %s917_s4  ;;  %p925_p6 = scmp.lt.u32.totalorder %s917_s4, %s1147_s29 }
 0x1fe   : > { %p919_p5 = pnand %p918_p4, %p1202_p11 }
 0x1ff   : > { %p924_p3 = por %p923_p1, %p922_p9 }
 0x200   : > { %p920_p7 = pneg %p919_p5 }
 0x201   : > { %p926_p12 = por %p925_p6, %p924_p3 }
 0x203   : > { %p927_p13 = pnand %p926_p12, %p920_p7 }
 0x205   : > { %930 = shalt.err (!%p927_p13)
}
 0x206   : > { %s978_s19 = smov 128   ;;  %s979_s20 = smov 8  }
 0x207   : > { %822 = dma.vmem_to_hbm [thread:$0]  (%p1202_p11), %s1141_s22, 512, %s1147_s29, %s622_s30, %s978_s19, %s978_s19, %s979_s20  }
 0x208 PF: > { %s650_s26 = sand.u32 1, %s957_s12   ;;  %p1203_p8 = scmp.ne.s32.totalorder %s1200_s25, 0 }
 0x209   : > { %p1204_p10 = scmp.ge.s32.totalorder %s969_s15, 2  ;;  %s651_s27 = scalar_lea.sflag [#allocation4], %s650_s26 }
 0x20b   : > { %p829_p0 = pnand %p1204_p10, %p1203_p8 }
 0x20d   : > { %952 = dma.done.wait (!%p829_p0), %s651_s27, 512  }
 0x20e   : > { %954 = vsyncadd (!%p829_p0), %s651_s27, 4294966784  ;;  %p16_p2 = scmp.ge.s32.totalorder %s1025_s18, 4   ;;  %s1205_s12 = smov %s961_s13 }
 0x20f   : > { %s1206_s13 = smov %s965_s14  ;;  %s1207_s14 = smov %s1037_s21 }
 0x210   : > { %s1208_s15 = smov %s1025_s18  ;;  %18 = sbr.rel (!%p16_p2) target bundleno = 5 (0x5), region = 77 }
 0x217   :  { %656 = vsyncpa [#allocation3], 1 }
 0x218   :  { %658 = vsyncpa [#allocation3 + $0x1], 1 }
 0x219   :  { %659 = vsyncpa [#allocation4], 1 }
 0x21a   :  { %661 = vsyncpa [#allocation4 + $0x1], 1 }

</bundles_post_ra>
